<compile_context>
chip_gen: v7x
topology: tpu7x:2x2x1
jax: 0.10.0
libtpu: 0.0.40
codegen_flags: <defaults>
</compile_context>

<pallas_src>
import jax
import jax.numpy as jnp
from jax.experimental import pallas as pl
from jax.experimental.pallas import tpu as pltpu

ALPHA = 0.1
INPUT_SIZE = 2
BASENET_HIDDEN = [50, 50]
N_CLASSES = 2
Z_DIM = 8
EPINET_HIDDEN = [15, 15]
PRIOR_HIDDEN = [5, 5]

# exposed layers = [True, False, True] -> exposed widths 2 (input) + 50 (a2)
SUM_EXPOSED = INPUT_SIZE + BASENET_HIDDEN[1]          # 52
EPI_OUT = N_CLASSES * Z_DIM                           # 16
EPI_H = EPINET_HIDDEN[0]                              # 15
PRIOR_H = PRIOR_HIDDEN[0]                             # 5
PRIOR_W = Z_DIM * PRIOR_H                             # 40 (packed prior ensemble width)

SHARED = PRIOR_W + EPI_H                              # 55 lanes: [h-path | c-path]
X_COLS = SHARED + BASENET_HIDDEN[0]                   # 105: [h0_x | c1_x | a1_pre]
A_COLS = SHARED + N_CLASSES                           # 57 : [h0_a | c1_a | base_pre]
TAIL = PRIOR_W + EPI_OUT                              # 56 : [h1 lanes | epi_flat lanes]
ZF1_COLS = SHARED + TAIL                              # 111
ZF2_COLS = TAIL + N_CLASSES                           # 58

BASENET_SIZES = [INPUT_SIZE] + BASENET_HIDDEN + [N_CLASSES]          # [2,50,50,2]
EPINET_SIZES = [SUM_EXPOSED + Z_DIM] + EPINET_HIDDEN + [EPI_OUT]     # [60,15,15,16]
PRIOR_SIZES = [SUM_EXPOSED] + PRIOR_HIDDEN + [N_CLASSES]             # [52,5,5,2]

# -----------------------------------------------------------------------------
# Single parameter slab: every tensor lives at an 8-aligned row offset of one
# (SLAB_ROWS, 128) f32 buffer, columns starting at lane 0.
# -----------------------------------------------------------------------------
_LAYOUT_ITEMS = [
    ("wx",    (INPUT_SIZE, X_COLS)),          # merged x bundle
    ("b0",    (1, BASENET_HIDDEN[0])),
    ("w1",    (BASENET_HIDDEN[0], BASENET_HIDDEN[1])),
    ("b1",    (1, BASENET_HIDDEN[1])),
    ("wa",    (BASENET_HIDDEN[1], A_COLS)),   # merged a2 bundle (same column order)
    ("b2",    (1, N_CLASSES)),
    ("bias0", (1, SHARED)),                   # [pb0 | eb0]
    ("w1c",   (SHARED, TAIL)),                # blockdiag(pw1_blockdiag, e1), last col 0
    ("b1c",   (1, TAIL)),                     # [pb1 | eb1 | 0]
    ("e2c",   (TAIL, TAIL)),                  # e2 placed on rows/cols 40..55
    ("eb2c",  (1, TAIL)),                     # [0(40) | eb2]
    ("wtail", (TAIL, N_CLASSES)),             # [pw2_stack ; per-class block-sum]
    ("wz1",   (Z_DIM, ZF1_COLS)),             # z -> [0|z@e0_z(15)] , [0|tile(z,2)(16)]
    ("wz2",   (Z_DIM, ZF2_COLS)),             # z -> [a*repeat(z,5)|0] , a*z@pb2
]


def _round8(n):
    return (n + 7) // 8 * 8


def _build_layout():
    layout, off = {}, 0
    for name, (r, c) in _LAYOUT_ITEMS:
        layout[name] = (off, r, c)
        off += _round8(r)
    return layout, off


LAYOUT, SLAB_ROWS = _build_layout()
SLAB_COLS = 128


# -----------------------------------------------------------------------------
# Kernel: 6 TB-row matmuls + 2 M=1 matmuls, pure MXU + VPU, no concats, no
# cross-lane reductions, no in-kernel loops.
# -----------------------------------------------------------------------------
def enn_kernel(x_ref, z_ref, p_ref, out_ref):
    f32 = jnp.float32

    def ld(name):
        off, r, c = LAYOUT[name]
        return p_ref[off:off + r, 0:c]          # static slice of the VMEM slab

    def mm(a, b):
        return jnp.dot(a, b, preferred_element_type=f32)

    x = x_ref[...]                                       # (TB, 2)
    z = z_ref[pl.ds(pl.program_id(1), 1), :]             # (1, Z_DIM) current draw

    # ---- every z-dependent term comes from two tiny M=1 matmuls ----
    zf1 = mm(z, ld("wz1"))                               # (1, 111)
    zf2 = mm(z, ld("wz2"))                               # (1, 58)
    z_add = zf1[:, 0:SHARED]            # [0(40) | z @ e0_z (15)]
    z_mul_c = zf1[:, SHARED:ZF1_COLS]   # [0(40) | tile(z, 2) (16)]
    z_mul_h = zf2[:, 0:TAIL]            # [alpha*repeat(z,5) (40) | 0(16)]
    z_bias = zf2[:, TAIL:ZF2_COLS]      # alpha * z @ pb2_stacked   (1, 2)

    # ---- x bundle: one K=2 matmul feeds prior-h0 / epinet-c1 / basenet-a1 ----
    xb = mm(x, ld("wx"))                                 # (TB, 105)
    a1 = jnp.maximum(xb[:, SHARED:X_COLS] + ld("b0"), 0.0)
    a2 = jnp.maximum(mm(a1, ld("w1")) + ld("b1"), 0.0)   # (TB, 50)

    # ---- a2 bundle, lane-aligned with the x bundle ----
    ab = mm(a2, ld("wa"))                                # (TB, 57)
    base = ab[:, SHARED:A_COLS] + ld("b2")               # (TB, 2) basenet logits

    # ---- shared epinet/prior layer 0: lanes = [h0 (40) | c1 (15)] ----
    act = jnp.maximum(xb[:, 0:SHARED] + ab[:, 0:SHARED] + ld("bias0") + z_add, 0.0)

    # ---- shared layer 1 (block-diag pw1 (+) e1): lanes = [h1 | c2 | 0] ----
    mid = jnp.maximum(mm(act, ld("w1c")) + ld("b1c"), 0.0)          # (TB, 56)

    # ---- epinet head emitted on lanes 40..55 so the tail stays aligned ----
    epi = mm(mid, ld("e2c")) + ld("eb2c")                           # (TB, 56)

    # ---- fused tail: epinet z-contract + alpha*prior from one (56,2) matmul ----
    tail_in = epi * z_mul_c + mid * z_mul_h
    tail = mm(tail_in, ld("wtail")) + z_bias                        # (TB, 2)

    out_ref[...] = (base + tail)[None, :, :]


def enn_forward(x, z, packed_params, *, batch_block=512, min_batch_blocks=1):
    """x: (B, input_size); z: (z_dim,) or (num_z, z_dim); packed_params: slab.

    Returns (B, n_classes) for a single z, or (num_z, B, n_classes) for a batch
    of epistemic samples.  Set `min_batch_blocks=2` on v7x so the batch axis has
    >= 2 grid steps and both TensorCores are used.
    """
    assert batch_block % 8 == 0, "batch_block must be a multiple of 8"
    B = x.shape[0]
    x = x.astype(jnp.float32)

    z2 = jnp.asarray(z, jnp.float32)
    squeeze_z = z2.ndim == 1
    if squeeze_z:
        z2 = z2.reshape(1, Z_DIM)
    assert z2.ndim == 2 and z2.shape[1] == Z_DIM
    num_z = z2.shape[0]

    tb = min(batch_block, B)
    if min_batch_blocks > 1 and B >= 8 * min_batch_blocks:
        tb = min(tb, _round8(pl.cdiv(B, min_batch_blocks)))
    if tb < B:
        tb = _round8(tb)                      # (8,128) tiling rule for partial blocks
    grid = (pl.cdiv(B, tb), num_z)

    out = pl.pallas_call(
        enn_kernel,
        out_shape=jax.ShapeDtypeStruct((num_z, B, N_CLASSES), jnp.float32),
        grid=grid,
        in_specs=[
            pl.BlockSpec((tb, INPUT_SIZE), lambda i, j: (i, 0)),
            pl.BlockSpec((num_z, Z_DIM), lambda i, j: (0, 0)),       # whole z table
            pl.BlockSpec((SLAB_ROWS, SLAB_COLS), lambda i, j: (0, 0)),
        ],
        out_specs=pl.BlockSpec((1, tb, N_CLASSES), lambda i, j: (j, i, 0)),
        compiler_params=pltpu.CompilerParams(
            dimension_semantics=("parallel", "parallel")),
    )(x, z2, packed_params)
    return out[0] if squeeze_z else out


# -----------------------------------------------------------------------------
# Host-side, one-time parameter repacking (all z-independent).
# -----------------------------------------------------------------------------
def pack_params(params):
    (w0, b0, w1, b1, w2, b2,
     e0, eb0, e1, eb1, e2, eb2,
     pw0, pb0, pw1, pb1, pw2, pb2) = [jnp.asarray(p, jnp.float32) for p in params]
    f32 = jnp.float32

    # prior layer 0: concat members along the output dim -> (52, 40)
    pw0_full = jnp.transpose(pw0, (1, 0, 2)).reshape(SUM_EXPOSED, PRIOR_W)
    # prior layer 1: block-diagonal (40, 40)
    pw1_bd = jnp.zeros((PRIOR_W, PRIOR_W), f32)
    for n in range(Z_DIM):
        s = n * PRIOR_H
        pw1_bd = pw1_bd.at[s:s + PRIOR_H, s:s + PRIOR_H].set(pw1[n])
    pw2_stack = pw2.reshape(PRIOR_W, N_CLASSES)
    pb0_row = pb0.reshape(1, PRIOR_W)
    pb1_row = pb1.reshape(1, PRIOR_W)
    pb2_stack = pb2.reshape(Z_DIM, N_CLASSES)

    # epinet layer 0 split row-wise (x rows / a2 rows / z rows)
    e0_x, e0_h, e0_z = e0[:INPUT_SIZE], e0[INPUT_SIZE:SUM_EXPOSED], e0[SUM_EXPOSED:]

    # static helper matrices for the z-fold
    eye_z = jnp.eye(Z_DIM, dtype=f32)
    zsel = jnp.tile(eye_z, (1, N_CLASSES))                                    # (8,16)
    ssum = jnp.kron(jnp.eye(N_CLASSES, dtype=f32), jnp.ones((Z_DIM, 1), f32)) # (16,2)
    rrep = jnp.kron(eye_z, jnp.ones((1, PRIOR_H), f32))                       # (8,40)

    # ---- column-merged bundles: [prior-40 | epinet-15 | tail] ----
    wx = jnp.concatenate([pw0_full[:INPUT_SIZE], e0_x, w0], axis=1)           # (2,105)
    wa = jnp.concatenate([pw0_full[INPUT_SIZE:], e0_h, w2], axis=1)           # (50,57)
    bias0 = jnp.concatenate([pb0_row, eb0.reshape(1, EPI_H)], axis=1)         # (1,55)

    # shared layer 1: blockdiag(pw1_bd(40), e1(15)) -> (55,56) (last col zero)
    w1c = jnp.zeros((SHARED, TAIL), f32)
    w1c = w1c.at[:PRIOR_W, :PRIOR_W].set(pw1_bd)
    w1c = w1c.at[PRIOR_W:SHARED, PRIOR_W:PRIOR_W + EPI_H].set(e1)
    b1c = jnp.zeros((1, TAIL), f32)
    b1c = b1c.at[:, :PRIOR_W].set(pb1_row)
    b1c = b1c.at[:, PRIOR_W:PRIOR_W + EPI_H].set(eb1.reshape(1, EPI_H))

    # epinet head placed on lanes 40..55
    e2c = jnp.zeros((TAIL, TAIL), f32).at[PRIOR_W:PRIOR_W + EPI_H, PRIOR_W:].set(e2)
    eb2c = jnp.zeros((1, TAIL), f32).at[:, PRIOR_W:].set(eb2.reshape(1, EPI_OUT))

    # fused tail weight: prior rows (40) then per-class block-sum rows (16)
    wtail = jnp.concatenate([pw2_stack, ssum], axis=0)                        # (56,2)

    # z-fold helper weights
    wz1 = jnp.zeros((Z_DIM, ZF1_COLS), f32)
    wz1 = wz1.at[:, PRIOR_W:SHARED].set(e0_z)                 # z @ e0_z on lanes 40..54
    wz1 = wz1.at[:, SHARED + PRIOR_W:].set(zsel)              # tile(z,2) on lanes 95..110
    wz2 = jnp.zeros((Z_DIM, ZF2_COLS), f32)
    wz2 = wz2.at[:, :PRIOR_W].set(ALPHA * rrep)               # alpha*repeat(z,5)
    wz2 = wz2.at[:, TAIL:].set(ALPHA * pb2_stack)             # alpha * z @ pb2

    entries = {
        "wx": wx, "b0": b0, "w1": w1, "b1": b1, "wa": wa, "b2": b2,
        "bias0": bias0, "w1c": w1c, "b1c": b1c, "e2c": e2c, "eb2c": eb2c,
        "wtail": wtail, "wz1": wz1, "wz2": wz2,
    }
    slab = jnp.zeros((SLAB_ROWS, SLAB_COLS), f32)
    for name, val in entries.items():
        off, r, c = LAYOUT[name]
        slab = slab.at[off:off + r, :c].set(jnp.asarray(val, f32).reshape(r, c))
    return slab


# -----------------------------------------------------------------------------
# Synthetic parameters (same shapes as the PyTorch module) + pure-JAX reference.
# -----------------------------------------------------------------------------
def init_params(key):
    keys = list(jax.random.split(key, 24))
    ki = iter(keys)

    def linear(in_f, out_f):
        bound = 1.0 / (in_f ** 0.5)
        w = jax.random.uniform(next(ki), (in_f, out_f), jnp.float32, -bound, bound)
        b = jax.random.uniform(next(ki), (1, out_f), jnp.float32, -bound, bound)
        return w, b

    def xavier_stack(in_f, out_f, k):
        bound = (6.0 / (in_f + out_f)) ** 0.5
        return jax.random.uniform(k, (Z_DIM, in_f, out_f), jnp.float32, -bound, bound)

    w0, b0 = linear(BASENET_SIZES[0], BASENET_SIZES[1])
    w1, b1 = linear(BASENET_SIZES[1], BASENET_SIZES[2])
    w2, b2 = linear(BASENET_SIZES[2], BASENET_SIZES[3])
    e0, eb0 = linear(EPINET_SIZES[0], EPINET_SIZES[1])
    e1, eb1 = linear(EPINET_SIZES[1], EPINET_SIZES[2])
    e2, eb2 = linear(EPINET_SIZES[2], EPINET_SIZES[3])
    pw0 = xavier_stack(PRIOR_SIZES[0], PRIOR_SIZES[1], next(ki))
    pw1 = xavier_stack(PRIOR_SIZES[1], PRIOR_SIZES[2], next(ki))
    pw2 = xavier_stack(PRIOR_SIZES[2], PRIOR_SIZES[3], next(ki))
    pb0 = jnp.zeros((Z_DIM, PRIOR_SIZES[1]), jnp.float32)   # frozen zeros in the module
    pb1 = jnp.zeros((Z_DIM, PRIOR_SIZES[2]), jnp.float32)
    pb2 = jnp.zeros((Z_DIM, PRIOR_SIZES[3]), jnp.float32)

    return (w0, b0, w1, b1, w2, b2,
            e0, eb0, e1, eb1, e2, eb2,
            pw0, pb0, pw1, pb1, pw2, pb2)


def reference_forward(x, z, params):
    (w0, b0, w1, b1, w2, b2,
     e0, eb0, e1, eb1, e2, eb2,
     pw0, pb0, pw1, pb1, pw2, pb2) = params
    a1 = jax.nn.relu(x @ w0 + b0)
    a2 = jax.nn.relu(a1 @ w1 + b1)
    base = a2 @ w2 + b2
    ch = jnp.concatenate([x, a2], axis=1)
    zr = jnp.broadcast_to(z[None, :], (x.shape[0], Z_DIM))
    comb = jnp.concatenate([ch, zr], axis=1)
    c1 = jax.nn.relu(comb @ e0 + eb0)
    c2 = jax.nn.relu(c1 @ e1 + eb1)
    ef = c2 @ e2 + eb2
    epi = jnp.einsum('bck,k->bc', ef.reshape(x.shape[0], N_CLASSES, Z_DIM), z)
    priors = []
    for n in range(Z_DIM):
        h = jax.nn.relu(ch @ pw0[n] + pb0[n])
        h = jax.nn.relu(h @ pw1[n] + pb1[n])
        priors.append(h @ pw2[n] + pb2[n])
    prior = jnp.einsum('nbo,n->bo', jnp.stack(priors, axis=0), z)
    return base + epi + ALPHA * prior


if __name__ == "__main__":
    key = jax.random.PRNGKey(0)
    kx, kz, kz2, kp = jax.random.split(key, 4)

    params = init_params(kp)
    packed = pack_params(params)                              # one-time repack

    # --- test 1: module-shaped call (single z, batch 8) ---
    B = 8
    x = jax.random.normal(kx, (B, INPUT_SIZE), jnp.float32)   # (batch, input_size)
    z = jax.random.normal(kz, (Z_DIM,), jnp.float32)          # epistemic index
    out = jax.block_until_ready(enn_forward(x, z, packed))
    ref = reference_forward(x, z, params)
    assert out.shape == (B, N_CLASSES)
    assert jnp.allclose(out, ref, rtol=1e-4, atol=1e-4), (out, ref)

    # --- test 2: batched epistemic samples + partial edge batch block ---
    B2, NZ = 20, 3
    x2 = jax.random.normal(kx, (B2, INPUT_SIZE), jnp.float32)
    zs = jax.random.normal(kz2, (NZ, Z_DIM), jnp.float32)
    out2 = jax.block_until_ready(enn_forward(x2, zs, packed, batch_block=8))
    ref2 = jnp.stack([reference_forward(x2, zs[i], params) for i in range(NZ)])
    assert out2.shape == (NZ, B2, N_CLASSES)
    assert jnp.allclose(out2, ref2, rtol=1e-4, atol=1e-4), (out2, ref2)

    print("KERNEL_OK")
</pallas_src>

<mosaic_0001>
module attributes {stable_mosaic.version = 11 : i64} {
  func.func @enn_kernel(%arg0: i32, %arg1: i32, %arg2: memref<8x2xf32, #tpu.memory_space<vmem>>, %arg3: memref<1x8xf32, #tpu.memory_space<vmem>>, %arg4: memref<352x128xf32, #tpu.memory_space<vmem>>, %arg5: memref<1x8x2xf32, #tpu.memory_space<vmem>>) attributes {dimension_semantics = [#tpu.dimension_semantics<parallel>, #tpu.dimension_semantics<parallel>], iteration_bounds = array<i64: 1, 1>, scalar_prefetch = 0 : i64, scratch_operands = 0 : i64, tpu.core_type = #tpu.core_type<tc>, window_params = [{transform_indices = @transform_0, window_bounds = array<i64: 8, 2>}, {pipeline_mode = #tpu.pipeline_mode<synchronous>, transform_indices = @transform_1, window_bounds = array<i64: 1, 8>}, {pipeline_mode = #tpu.pipeline_mode<synchronous>, transform_indices = @transform_2, window_bounds = array<i64: 352, 128>}, {transform_indices = @transform_3, window_bounds = array<i64: 1, 8, 2>}]} {
    %c0 = arith.constant 0 : index
    %c0_0 = arith.constant 0 : index
    %0 = vector.load %arg2[%c0, %c0_0] : memref<8x2xf32, #tpu.memory_space<vmem>>, vector<8x2xf32>
    %1 = arith.index_cast %arg1 : i32 to index
    %c0_1 = arith.constant 0 : index
    %2 = vector.load %arg3[%1, %c0_1] : memref<1x8xf32, #tpu.memory_space<vmem>>, vector<1x8xf32>
    %c336 = arith.constant 336 : index
    %c0_2 = arith.constant 0 : index
    %3 = vector.load %arg4[%c336, %c0_2] : memref<352x128xf32, #tpu.memory_space<vmem>>, vector<8x111xf32>
    %cst = arith.constant dense<0.000000e+00> : vector<1x111xf32>
    %4 = tpu.matmul %2, %3, %cst {dimension_numbers = #tpu.dot_dimension_numbers<[1], [0], [0], [1], [0, 0, 1, 1], [], []>} : vector<1x8xf32>, vector<8x111xf32>, vector<1x111xf32> -> vector<1x111xf32>
    %c344 = arith.constant 344 : index
    %c0_3 = arith.constant 0 : index
    %5 = vector.load %arg4[%c344, %c0_3] : memref<352x128xf32, #tpu.memory_space<vmem>>, vector<8x58xf32>
    %cst_4 = arith.constant dense<0.000000e+00> : vector<1x58xf32>
    %6 = tpu.matmul %2, %5, %cst_4 {dimension_numbers = #tpu.dot_dimension_numbers<[1], [0], [0], [1], [0, 0, 1, 1], [], []>} : vector<1x8xf32>, vector<8x58xf32>, vector<1x58xf32> -> vector<1x58xf32>
    %7 = vector.extract_strided_slice %4 {offsets = [0, 0], sizes = [1, 55], strides = [1, 1]} : vector<1x111xf32> to vector<1x55xf32>
    %8 = vector.extract_strided_slice %4 {offsets = [0, 55], sizes = [1, 56], strides = [1, 1]} : vector<1x111xf32> to vector<1x56xf32>
    %9 = vector.extract_strided_slice %6 {offsets = [0, 0], sizes = [1, 56], strides = [1, 1]} : vector<1x58xf32> to vector<1x56xf32>
    %10 = vector.extract_strided_slice %6 {offsets = [0, 56], sizes = [1, 2], strides = [1, 1]} : vector<1x58xf32> to vector<1x2xf32>
    %c0_5 = arith.constant 0 : index
    %c0_6 = arith.constant 0 : index
    %11 = vector.load %arg4[%c0_5, %c0_6] : memref<352x128xf32, #tpu.memory_space<vmem>>, vector<2x105xf32>
    %cst_7 = arith.constant dense<0.000000e+00> : vector<8x105xf32>
    %12 = tpu.matmul %0, %11, %cst_7 {dimension_numbers = #tpu.dot_dimension_numbers<[1], [0], [0], [1], [0, 0, 1, 1], [], []>} : vector<8x2xf32>, vector<2x105xf32>, vector<8x105xf32> -> vector<8x105xf32>
    %13 = vector.extract_strided_slice %12 {offsets = [0, 55], sizes = [8, 50], strides = [1, 1]} : vector<8x105xf32> to vector<8x50xf32>
    %c8 = arith.constant 8 : index
    %c0_8 = arith.constant 0 : index
    %14 = vector.load %arg4[%c8, %c0_8] : memref<352x128xf32, #tpu.memory_space<vmem>>, vector<1x50xf32>
    %15 = vector.broadcast %14 : vector<1x50xf32> to vector<8x50xf32>
    %16 = arith.addf %13, %15 : vector<8x50xf32>
    %cst_9 = arith.constant 0.000000e+00 : f32
    %17 = vector.broadcast %cst_9 : f32 to vector<8x50xf32>
    %18 = arith.maximumf %16, %17 : vector<8x50xf32>
    %c16 = arith.constant 16 : index
    %c0_10 = arith.constant 0 : index
    %19 = vector.load %arg4[%c16, %c0_10] : memref<352x128xf32, #tpu.memory_space<vmem>>, vector<50x50xf32>
    %cst_11 = arith.constant dense<0.000000e+00> : vector<8x50xf32>
    %20 = tpu.matmul %18, %19, %cst_11 {dimension_numbers = #tpu.dot_dimension_numbers<[1], [0], [0], [1], [0, 0, 1, 1], [], []>} : vector<8x50xf32>, vector<50x50xf32>, vector<8x50xf32> -> vector<8x50xf32>
    %c72 = arith.constant 72 : index
    %c0_12 = arith.constant 0 : index
    %21 = vector.load %arg4[%c72, %c0_12] : memref<352x128xf32, #tpu.memory_space<vmem>>, vector<1x50xf32>
    %22 = vector.broadcast %21 : vector<1x50xf32> to vector<8x50xf32>
    %23 = arith.addf %20, %22 : vector<8x50xf32>
    %cst_13 = arith.constant 0.000000e+00 : f32
    %24 = vector.broadcast %cst_13 : f32 to vector<8x50xf32>
    %25 = arith.maximumf %23, %24 : vector<8x50xf32>
    %c80 = arith.constant 80 : index
    %c0_14 = arith.constant 0 : index
    %26 = vector.load %arg4[%c80, %c0_14] : memref<352x128xf32, #tpu.memory_space<vmem>>, vector<50x57xf32>
    %cst_15 = arith.constant dense<0.000000e+00> : vector<8x57xf32>
    %27 = tpu.matmul %25, %26, %cst_15 {dimension_numbers = #tpu.dot_dimension_numbers<[1], [0], [0], [1], [0, 0, 1, 1], [], []>} : vector<8x50xf32>, vector<50x57xf32>, vector<8x57xf32> -> vector<8x57xf32>
    %28 = vector.extract_strided_slice %27 {offsets = [0, 55], sizes = [8, 2], strides = [1, 1]} : vector<8x57xf32> to vector<8x2xf32>
    %c136 = arith.constant 136 : index
    %c0_16 = arith.constant 0 : index
    %29 = vector.load %arg4[%c136, %c0_16] : memref<352x128xf32, #tpu.memory_space<vmem>>, vector<1x2xf32>
    %30 = vector.broadcast %29 : vector<1x2xf32> to vector<8x2xf32>
    %31 = arith.addf %28, %30 : vector<8x2xf32>
    %32 = vector.extract_strided_slice %12 {offsets = [0, 0], sizes = [8, 55], strides = [1, 1]} : vector<8x105xf32> to vector<8x55xf32>
    %33 = vector.extract_strided_slice %27 {offsets = [0, 0], sizes = [8, 55], strides = [1, 1]} : vector<8x57xf32> to vector<8x55xf32>
    %34 = arith.addf %32, %33 : vector<8x55xf32>
    %c144 = arith.constant 144 : index
    %c0_17 = arith.constant 0 : index
    %35 = vector.load %arg4[%c144, %c0_17] : memref<352x128xf32, #tpu.memory_space<vmem>>, vector<1x55xf32>
    %36 = vector.broadcast %35 : vector<1x55xf32> to vector<8x55xf32>
    %37 = arith.addf %34, %36 : vector<8x55xf32>
    %38 = vector.broadcast %7 : vector<1x55xf32> to vector<8x55xf32>
    %39 = arith.addf %37, %38 : vector<8x55xf32>
    %cst_18 = arith.constant 0.000000e+00 : f32
    %40 = vector.broadcast %cst_18 : f32 to vector<8x55xf32>
    %41 = arith.maximumf %39, %40 : vector<8x55xf32>
    %c152 = arith.constant 152 : index
    %c0_19 = arith.constant 0 : index
    %42 = vector.load %arg4[%c152, %c0_19] : memref<352x128xf32, #tpu.memory_space<vmem>>, vector<55x56xf32>
    %cst_20 = arith.constant dense<0.000000e+00> : vector<8x56xf32>
    %43 = tpu.matmul %41, %42, %cst_20 {dimension_numbers = #tpu.dot_dimension_numbers<[1], [0], [0], [1], [0, 0, 1, 1], [], []>} : vector<8x55xf32>, vector<55x56xf32>, vector<8x56xf32> -> vector<8x56xf32>
    %c208 = arith.constant 208 : index
    %c0_21 = arith.constant 0 : index
    %44 = vector.load %arg4[%c208, %c0_21] : memref<352x128xf32, #tpu.memory_space<vmem>>, vector<1x56xf32>
    %45 = vector.broadcast %44 : vector<1x56xf32> to vector<8x56xf32>
    %46 = arith.addf %43, %45 : vector<8x56xf32>
    %cst_22 = arith.constant 0.000000e+00 : f32
    %47 = vector.broadcast %cst_22 : f32 to vector<8x56xf32>
    %48 = arith.maximumf %46, %47 : vector<8x56xf32>
    %c216 = arith.constant 216 : index
    %c0_23 = arith.constant 0 : index
    %49 = vector.load %arg4[%c216, %c0_23] : memref<352x128xf32, #tpu.memory_space<vmem>>, vector<56x56xf32>
    %cst_24 = arith.constant dense<0.000000e+00> : vector<8x56xf32>
    %50 = tpu.matmul %48, %49, %cst_24 {dimension_numbers = #tpu.dot_dimension_numbers<[1], [0], [0], [1], [0, 0, 1, 1], [], []>} : vector<8x56xf32>, vector<56x56xf32>, vector<8x56xf32> -> vector<8x56xf32>
    %c272 = arith.constant 272 : index
    %c0_25 = arith.constant 0 : index
    %51 = vector.load %arg4[%c272, %c0_25] : memref<352x128xf32, #tpu.memory_space<vmem>>, vector<1x56xf32>
    %52 = vector.broadcast %51 : vector<1x56xf32> to vector<8x56xf32>
    %53 = arith.addf %50, %52 : vector<8x56xf32>
    %54 = vector.broadcast %8 : vector<1x56xf32> to vector<8x56xf32>
    %55 = arith.mulf %53, %54 : vector<8x56xf32>
    %56 = vector.broadcast %9 : vector<1x56xf32> to vector<8x56xf32>
    %57 = arith.mulf %48, %56 : vector<8x56xf32>
    %58 = arith.addf %55, %57 : vector<8x56xf32>
    %c280 = arith.constant 280 : index
    %c0_26 = arith.constant 0 : index
    %59 = vector.load %arg4[%c280, %c0_26] : memref<352x128xf32, #tpu.memory_space<vmem>>, vector<56x2xf32>
    %cst_27 = arith.constant dense<0.000000e+00> : vector<8x2xf32>
    %60 = tpu.matmul %58, %59, %cst_27 {dimension_numbers = #tpu.dot_dimension_numbers<[1], [0], [0], [1], [0, 0, 1, 1], [], []>} : vector<8x56xf32>, vector<56x2xf32>, vector<8x2xf32> -> vector<8x2xf32>
    %61 = vector.broadcast %10 : vector<1x2xf32> to vector<8x2xf32>
    %62 = arith.addf %60, %61 : vector<8x2xf32>
    %63 = arith.addf %31, %62 : vector<8x2xf32>
    %64 = vector.shape_cast %63 : vector<8x2xf32> to vector<1x8x2xf32>
    %c0_28 = arith.constant 0 : index
    %c0_29 = arith.constant 0 : index
    %c0_30 = arith.constant 0 : index
    %65 = vector.load %arg5[%c0_28, %c0_29, %c0_30] : memref<1x8x2xf32, #tpu.memory_space<vmem>>, vector<1x8x2xf32>
    tpu.vector_store %arg5[%c0_28, %c0_29, %c0_30], %64 {strides = array<i32>} : memref<1x8x2xf32, #tpu.memory_space<vmem>>, vector<1x8x2xf32>,
    return
  }
  func.func @transform_0(%arg0: i32, %arg1: i32) -> (i32, i32) {
    %c0_i32 = arith.constant 0 : i32
    %c0_i32_0 = arith.constant 0 : i32
    return %arg0, %c0_i32 : i32, i32
  }
  func.func @transform_1(%arg0: i32, %arg1: i32) -> (i32, i32) {
    %c0_i32 = arith.constant 0 : i32
    %c0_i32_0 = arith.constant 0 : i32
    %c0_i32_1 = arith.constant 0 : i32
    return %c0_i32, %c0_i32_0 : i32, i32
  }
  func.func @transform_2(%arg0: i32, %arg1: i32) -> (i32, i32) {
    %c0_i32 = arith.constant 0 : i32
    %c0_i32_0 = arith.constant 0 : i32
    %c0_i32_1 = arith.constant 0 : i32
    return %c0_i32, %c0_i32_0 : i32, i32
  }
  func.func @transform_3(%arg0: i32, %arg1: i32) -> (i32, i32, i32) {
    %c0_i32 = arith.constant 0 : i32
    %c0_i32_0 = arith.constant 0 : i32
    return %arg1, %arg0, %c0_i32 : i32, i32, i32
  }
}

</mosaic_0001>

<bundles_post_ra>
// kernel: tpu_custom_call.1
= control target key start
LH: loop header
LB: loop body
LE: loop exit
PB: predicated region body
PF: predicated region fallthrough
CT: control target
= control target key end

     0   :  { %8 = vsyncpa [#allocation3], 0  ;;  %s993_s12 = smov [#allocation2]   ;;  %s1105_s0 = inlined_call_operand.vmem [shape: f32[8,2], index: 0, kind: input, shape index: {}]   ;;  %s1106_s1 = inlined_call_operand.vmem [shape: f32[1,8], index: 1, kind: input, shape index: {}]   ;;  %s1107_s2 = inlined_call_operand.hbm [shape: f32[352,128], index: 2, kind: input, shape index: {}]   ;;  %s1108_s3 = inlined_call_operand.vmem [shape: f32[1,8,2], index: 3, kind: output, shape index: {}]  }
   0x1   :  { %s18_s13 = sshll.u32 %s993_s12, 4  ;;  %s969_s16 = scalar_lea.hbm %s1107_s2, 5632  ;;  %s19_s13 = int_to_ptr.vmem [resolvable:$true] %s18_s13 }
   0x2   :  { %p970_p0 = scmp.ne.s32.totalorder %s1107_s2, %s969_s16  ;;  %p973_p1 = scmp.lt.u32.totalorder %s969_s16, %s1107_s2 }
   0x4   :  { %p975_p2 = pnand %p973_p1, %p970_p0 }
   0x6   :  { %978 = shalt.err (!%p975_p2)
}
   0x7   :  { %s979_s21 = scalar_lea.vmem %s19_s13, 5632  ;;  %p984_p4 = scmp.lt.s32.totalorder %s19_s13, %s19_s13 }
   0x8   :  { %p980_p3 = scmp.ne.s32.totalorder %s19_s13, %s979_s21  ;;  %p985_p5 = scmp.lt.s32.totalorder %s979_s21, %s979_s21 }
   0xa   :  { %p986_p6 = por %p985_p5, %p984_p4 }
   0xc   :  { %p987_p7 = pnand %p986_p6, %p980_p3 }
   0xe   :  { %990 = shalt.err (!%p987_p7)
}
   0xf   :  { %s994_s22 = smov 128   ;;  %s995_s23 = smov 8  }
  0x10   :  { %24 = dma.hbm_to_vmem [thread:$0]  %s1107_s2, 5632, %s19_s13, [#allocation3], %s994_s22, %s994_s22, %s995_s23  }
  0x11   :  { %991 = dma.done.wait [#allocation3], 5632  }
  0x12   :  { %992 = vsyncadd [#allocation3], 4294961664  ;;  %v996_v0 = vmov 0.0   ;;  %vm997_vm0 = vmmov 0   ;;  %vm31_vm1 = vcmask 64512   ;;  %v30_v1 = vld [vmem:[#allocation2 + $0x150] sm:$0xff]  ;;  %v458_v13 = vlaneseq }
  0x13   :  { %815 = vmatprep.subr.mxu0 %v996_v0  ;;  %817 = vmatprep.mubr.msk.f32.mxu0 %vm997_vm0, %v996_v0  ;;  %v29_v2 = vld [vmem:[%s1106_s1] sm:$0x1]  ;;  %v105_v3 = vld [vmem:[#allocation2 + $0x158] sm:$0xff]  ;;  %v755_v4 = vld [vmem:[#allocation2 + $0x8] ss:$0 sm:$0xff]  ;;  %vm181_vm2 = vcmask 1041408  }
  0x14   :  { %844 = vmatprep.mubr.msk.f32.mxu1 %vm997_vm0, %v996_v0  ;;  %816 = vmatpush3.msra.mxu0 %v30_v1  ;;  %v176_v5 = vld [vmem:[#allocation2] sm:$0x3]  ;;  %s998_s2 = smov 55   ;;  %vm177_vm3 = vcmask 15360   ;;  %v266_v7 = vld [vmem:[#allocation2 + $0x10] sm:$0xff]  ;;  %v267_v8 = vld [vmem:[#allocation2 + $0x18] sm:$0xff] }
  0x15   :  { %818 = vmatmul.mubr.msk.f32.vlgmr.msra.gmra.mrb[0].mxu0 %vm31_vm1, %v29_v2  ;;  %820 = vmatprep.subr.mxu0 %v996_v0  ;;  %v28_v6 = vld [vmem:[%s1105_s0] sm:$0xff]  ;;  %v999_v9 = vmov 0.0|0.0   ;;  %v916_v10 = vpack.c.bf16 %v267_v8, %v266_v7  ;;  %v269_v12 = vld [vmem:[#allocation2 + $0x28] sm:$0xff]  ;;  %v270_v15 = vld [vmem:[#allocation2 + $0x30] sm:$0xff]  ;;  %v459_v17 = vshrl.u32 %v458_v13, 7  ;;  %s1000_s0 = smov 73  }
  0x16   :  { %821 = vmatpush3.msra.mxu0 %v105_v3  ;;  %822 = vmatprep.mubr.msk.f32.mxu0 %vm997_vm0, %v996_v0  ;;  %v268_v11 = vld [vmem:[#allocation2 + $0x20] sm:$0xff]  ;;  %v271_v16 = vld [vmem:[#allocation2 + $0x38] sm:$0xff]  ;;  %v358_v22 = vld [vmem:[#allocation2 + $0x50] sm:$0xff]  ;;  %s1001_s29 = smov 72   ;;  %vm281_vm4 = vcmask 408576   ;;  %vm480_vm5 = vcmask 1046528  }
  0x17   :  { %825 = vmatprep.subr.mxu0 %v996_v0  ;;  %261 = vrot.lane.b32.xlu0 %v755_v4, %s998_s2  ;;  %v919_v14 = vpack.c.bf16 %v269_v12, %v268_v11  ;;  %v922_v18 = vpack.c.bf16 %v271_v16, %v270_v15  ;;  %v272_v19 = vld [vmem:[#allocation2 + $0x40] sm:$0x3]  ;;  %v460_v20 = vsub.s32 0, %v459_v17  ;;  %v359_v23 = vld [vmem:[#allocation2 + $0x58] sm:$0xff]  ;;  %v361_v28 = vld [vmem:[#allocation2 + $0x68] sm:$0xff]  ;;  %vm476_vm6 = vcmask 449536  }
  0x18   :  { %915 = vmatprep.subr.bf16.mxu1 %v999_v9  ;;  %v360_v24 = vld [vmem:[#allocation2 + $0x60] sm:$0xff]  ;;  %v925_v27 = vpack.c.bf16 %v359_v23, %v358_v22  ;;  %v362_v39 = vld [vmem:[#allocation2 + $0x70] sm:$0xff]  ;;  %v363_v40 = vld [vmem:[#allocation2 + $0x78] sm:$0xff]  ;;  %vm567_vm7 = vcmask 457728  }
  0x19   :  { %823 = vmatmul.mubr.msk.f32.vlgmr.msra.gmra.mrb[2].mxu0 %vm31_vm1, %v29_v2  ;;  %917 = vmatpush3.bf16.msra.mxu1 %v916_v10  ;;  %v928_v29 = vpack.c.bf16 %v361_v28, %v360_v24  ;;  %v931_v41 = vpack.c.bf16 %v363_v40, %v362_v39  ;;  %v364_v42 = vld [vmem:[#allocation2 + $0x80] sm:$0x3]  ;;  %v761_v43 = vld [vmem:[#allocation2 + $0x88] ss:$0 sm:$0xff]  ;;  %v464_v44 = vld [vmem:[#allocation2 + $0x98] sm:$0xff] }
  0x1a   :  { %826 = vmatpush3.msk.msra.mxu0 %vm181_vm2, %v176_v5  ;;  %827 = vmatprep.mubr.msk.f32.mxu0 %vm997_vm0, %v996_v0  ;;  %v465_v45 = vld [vmem:[#allocation2 + $0xa0] sm:$0xff]  ;;  %v756_v47 = vld [vmem:[#allocation2 + $0x48] ss:$0 sm:$0xff]  ;;  %v467_v53 = vld [vmem:[#allocation2 + $0xb0] sm:$0xff] }
  0x1b   :  { %924 = vmatprep.subr.bf16.mxu0 %v999_v9  ;;  %918 = vmatprep.subr.bf16.mxu1 %v999_v9  ;;  %v934_v46 = vpack.c.bf16 %v465_v45, %v464_v44  ;;  %v466_v52 = vld [vmem:[#allocation2 + $0xa8] sm:$0xff]  ;;  %v468_v55 = vld [vmem:[#allocation2 + $0xb8] sm:$0xff]  ;;  %v469_v56 = vld [vmem:[#allocation2 + $0xc0] sm:$0xff] }
  0x1c   :  { %v937_v54 = vpack.c.bf16 %v467_v53, %v466_v52  ;;  %v940_v57 = vpack.c.bf16 %v469_v56, %v468_v55  ;;  %v470_v58 = vld [vmem:[#allocation2 + $0xc8] sm:$0x7f]  ;;  %v555_v59 = vld [vmem:[#allocation2 + $0xd8] sm:$0xff]  ;;  %v556_v60 = vld [vmem:[#allocation2 + $0xe0] sm:$0xff] }
  0x1d   :  { %828 = vmatmul.mubr.msk.f32.vlgmr.msra.gmra.mrb[4].mxu0 %vm177_vm3, %v28_v6  ;;  %920 = vmatpush3.bf16.msra.mxu1 %v919_v14  ;;  %v557_v61 = vld [vmem:[#allocation2 + $0xe8] sm:$0xff]  ;;  %v943_v62 = vpack.c.bf16 %v556_v60, %v555_v59  ;;  %v558_v63 = vld [vmem:[#allocation2 + $0xf0] sm:$0xff]  ;;  %v559_v10 = vld [vmem:[#allocation2 + $0xf8] sm:$0xff] }
  0x1e   :  { %861 = vmatprep.mubr.msk.f32.mxu0 %vm997_vm0, %v996_v0  ;;  %921 = vmatprep.subr.bf16.mxu1 %v999_v9  ;;  %v946_v1 = vpack.c.bf16 %v558_v63, %v557_v61  ;;  %v762_v3 = vld [vmem:[#allocation2 + $0x90] ss:$0 sm:$0xff]  ;;  %v560_v11 = vld [vmem:[#allocation2 + $0x100] sm:$0xff]  ;;  %v561_v13 = vld [vmem:[#allocation2 + $0x108] sm:$0xff] }
  0x1f   :  { %926 = vmatpush3.bf16.msra.mxu0 %v925_v27  ;;  %v949_v12 = vpack.c.bf16 %v560_v11, %v559_v10  ;;  %v652_v14 = vld [vmem:[#allocation2 + $0x118] sm:$0xff]  ;;  %v653_v15 = vld [vmem:[#allocation2 + $0x120] sm:$0xff]  ;;  %v654_v16 = vld [vmem:[#allocation2 + $0x128] sm:$0xff] }
  0x20   :  { %927 = vmatprep.subr.bf16.mxu0 %v999_v9  ;;  %v952_v17 = vpack.c.bf16 %v653_v15, %v652_v14  ;;  %v658_v28 = vld [vmem:[#allocation2 + $0x148] sm:$0xff] }
  0x21   :  { %923 = vmatpush3.bf16.msra.mxu1 %v922_v18  ;;  %v655_v18 = vld [vmem:[#allocation2 + $0x130] sm:$0xff] }
  0x22   :  { %842 = vmatprep.subr.mxu1 %v996_v0 }
  0x23   :  { %929 = vmatpush3.bf16.msra.mxu0 %v928_v29  ;;  %v766_v29 = vld [vmem:[#allocation2 + $0x110] ss:$0 sm:$0xff] }
  0x24   :  { %930 = vmatprep.subr.bf16.mxu0 %v999_v9 }
  0x25   :  { %843 = vmatpush3.msk.msra.mxu1 %vm181_vm2, %v272_v19  ;;  %v955_v19 = vpack.c.bf16 %v655_v18, %v654_v16 }
  0x26   :  { %933 = vmatprep.subr.bf16.mxu1 %v999_v9 }
  0x27   :  { %932 = vmatpush3.bf16.msra.mxu0 %v931_v41 }
  0x28   :  { %859 = vmatprep.subr.mxu0 %v996_v0 }
  0x2b   :  { %860 = vmatpush3.msk.msra.mxu0 %vm181_vm2, %v364_v42 }
  0x2c   :  { %942 = vmatprep.subr.bf16.mxu0 %v999_v9 }
  0x89   :  { %v262_v33 = vpop.permute.xlu0 %261 }
  0xe8   :  { %v101_v21 = vpop.f32.mrb[0].mxu0 }
  0xe9   :  { %v1063_v25 = vrot.slane %v101_v21, %v460_v20  ;;  %v819_v26 = vpop.f32.mrb[1].mxu0 }
  0xea   :  { %v657_v26 = vld [vmem:[#allocation2 + $0x140] sm:$0xff] }
  0xeb   :  { %642 = vrot.lane.b32.xlu1 %v1063_v25, %s1000_s0 }
  0xec   :  { %v172_v30 = vpop.f32.mrb[2].mxu0 }
  0xed   :  { %v1068_v31 = vrot.slane %v172_v30, %v460_v20  ;;  %v824_v32 = vpop.f32.mrb[3].mxu0  ;;  %v763_v20 = vld [vmem:[#allocation2 + $0xd0] ss:$0 sm:$0xff] }
  0xef   :  { %660 = vrot.lane.b32.xlu1 %v1068_v31, %s1001_s29 }
  0xf0   :  { %v251_v34 = vpop.f32.mrb[4].mxu0 }
  0xf1   :  { %v264_v35 = vadd.f32 %v262_v33, %v251_v34  ;;  %v829_v36 = vpop.f32.mrb[5].mxu0 }
  0xf3   :  { %v265_v37 = vmax.f32 %v264_v35, 0.0 }
  0xf5   :  { %279 = vrot.lane.b32.xlu0 %v265_v37, %s1000_s0 }
  0xf9   :  { %447 = vrot.lane.b32.xlu0 %v761_v43, %s998_s2 }
 0x15d   :  { %v643_v33 = vpop.permute.xlu1 %642 }
 0x161   :  { %v661_v37 = vpop.permute.xlu1 %660 }
 0x167   :  { %v280_v38 = vpop.permute.xlu0 %279 }
 0x168   :  { %845 = vmatmul.mubr.msk.f32.vlgmr.msra.gmra.mrb[0].mxu1 %vm281_vm4, %v280_v38 }
 0x169   :  { %878 = vmatprep.mubr.msk.f32.mxu1 %vm997_vm0, %v996_v0  ;;  %935 = vmatpush3.bf16.msra.mxu1 %v934_v46 }
 0x16a   :  { %936 = vmatprep.subr.bf16.mxu1 %v999_v9 }
 0x16d   :  { %938 = vmatpush3.bf16.msra.mxu1 %v937_v54 }
 0x16e   :  { %939 = vmatprep.subr.bf16.mxu1 %v999_v9 }
 0x171   :  { %941 = vmatpush3.bf16.msra.mxu1 %v940_v57 }
 0x172   :  { %876 = vmatprep.subr.mxu1 %v996_v0 }
 0x175   :  { %877 = vmatpush3.msk.msra.mxu1 %vm480_vm5, %v470_v58 }
 0x176   :  { %951 = vmatprep.subr.bf16.mxu1 %v999_v9 }
 0x23b   :  { %v353_v48 = vpop.f32.mrb[0].mxu1 }
 0x23c   :  { %v354_v49 = vadd.f32 %v756_v47, %v353_v48  ;;  %v846_v50 = vpop.f32.mrb[1].mxu1 }
 0x23e   :  { %v357_v51 = vmax.f32 %v354_v49, 0.0 }
 0x240   :  { %862 = vmatmul.mubr.msk.f32.vlgmr.msra.gmra.mrb[6].mxu0 %vm281_vm4, %v357_v51 }
 0x241   :  { %895 = vmatprep.mubr.msk.f32.mxu0 %vm997_vm0, %v996_v0  ;;  %944 = vmatpush3.bf16.msra.mxu0 %v943_v62 }
 0x242   :  { %945 = vmatprep.subr.bf16.mxu0 %v999_v9 }
 0x245   :  { %947 = vmatpush3.bf16.msra.mxu0 %v946_v1 }
 0x246   :  { %948 = vmatprep.subr.bf16.mxu0 %v999_v9 }
 0x249   :  { %950 = vmatpush3.bf16.msra.mxu0 %v949_v12 }
 0x24a   :  { %893 = vmatprep.subr.mxu0 %v996_v0 }
 0x24d   :  { %894 = vmatpush3.msra.mxu0 %v561_v13 }
 0x313   :  { %v437_v2 = vpop.f32.mrb[6].mxu0 }
 0x314   :  { %v451_v4 = vadd.f32 %v437_v2, %v251_v34  ;;  %v863_v5 = vpop.f32.mrb[7].mxu0 }
 0x316   :  { %v457_v6 = vadd.f32 %v762_v3, %v451_v4 }
 0x318   :  { %v462_v7 = vadd.f32 %v1063_v25, %v457_v6  ;;  %v656_v25 = vld [vmem:[#allocation2 + $0x138] sm:$0xff] }
 0x319   :  { %v958_v27 = vpack.c.bf16 %v657_v26, %v656_v25 }
 0x31a   :  { %v463_v8 = vmax.f32 %v462_v7, 0.0 }
 0x31c   :  { %879 = vmatmul.mubr.msk.f32.vlgmr.msra.gmra.mrb[2].mxu1 %vm476_vm6, %v463_v8 }
 0x31d   :  { %912 = vmatprep.mubr.msk.f32.mxu1 %vm997_vm0, %v996_v0  ;;  %953 = vmatpush3.bf16.msra.mxu1 %v952_v17 }
 0x31e   :  { %954 = vmatprep.subr.bf16.mxu1 %v999_v9 }
 0x321   :  { %956 = vmatpush3.bf16.msra.mxu1 %v955_v19 }
 0x322   :  { %957 = vmatprep.subr.bf16.mxu1 %v999_v9 }
 0x325   :  { %959 = vmatpush3.bf16.msra.mxu1 %v958_v27 }
 0x326   :  { %910 = vmatprep.subr.mxu1 %v996_v0  ;;  %v448_v0 = vpop.permute.xlu0 %447 }
 0x327   :  { %v450_v41 = vadd.f32 %v448_v0, %v437_v2 }
 0x329   :  { %911 = vmatpush3.msra.mxu1 %v658_v28 }
 0x3ef   :  { %v550_v21 = vpop.f32.mrb[2].mxu1 }
 0x3f0   :  { %v551_v22 = vadd.f32 %v763_v20, %v550_v21  ;;  %v880_v23 = vpop.f32.mrb[3].mxu1 }
 0x3f2   :  { %v554_v24 = vmax.f32 %v551_v22, 0.0 }
 0x3f4   :  { %896 = vmatmul.mubr.msk.f32.vlgmr.msra.gmra.mrb[8].mxu0 %vm567_vm7, %v554_v24  ;;  %v650_v34 = vmul.f32 %v1068_v31, %v554_v24 }
 0x4c7   :  { %v637_v30 = vpop.f32.mrb[8].mxu0 }
 0x4c8   :  { %v638_v32 = vadd.f32 %v766_v29, %v637_v30  ;;  %v897_v9 = vpop.f32.mrb[9].mxu0 }
 0x4ca   :  { %v645_v35 = vmul.f32 %v643_v33, %v638_v32 }
 0x4cc   :  { %v651_v36 = vadd.f32 %v650_v34, %v645_v35 }
 0x4ce   :  { %913 = vmatmul.mubr.msk.f32.vlgmr.msra.gmra.mrb[4].mxu1 %vm567_vm7, %v651_v36 }
 0x5a1   :  { %v732_v38 = vpop.f32.mrb[4].mxu1 }
 0x5a2   :  { %v733_v39 = vadd.f32 %v732_v38, %v661_v37  ;;  %v914_v40 = vpop.f32.mrb[5].mxu1 }
 0x5a4   :  { %737 = vrot.lane.b32.xlu1 %v733_v39, %s998_s2 }
 0x616   :  { %v738_v42 = vpop.permute.xlu1 %737 }
 0x617   :  { %v740_v43 = vadd.f32 %v738_v42, %v450_v41 }
 0x619   :  { %742 = vrot.lane.b32.xlu0 %v740_v43, %s1000_s0 }
 0x68b   :  { %v743_v44 = vpop.permute.xlu0 %742 }
 0x68c   :  { %745 = vst.msk [vmem:[%s1108_s3] sm:$0xff] %vm177_vm3, %v743_v44 }
 0x68d   :  { %750 = vsyncpa [#allocation3], 1 }

</bundles_post_ra>
